<compile_context>
chip_gen: v7x
topology: tpu7x:2x2x1
jax: 0.10.0
libtpu: 0.0.40
codegen_flags: <defaults>
</compile_context>

<pallas_src>
import jax
import jax.numpy as jnp
from jax.experimental import pallas as pl
from jax.experimental.pallas import tpu as pltpu

LANE = 128      # TPU lane width: last dims kept as multiples of 128 -> unmasked stores
SUBLANE = 16    # bf16 sublane packing granularity for the batch (row) dimension


def _round_up(n, m):
    return ((n + m - 1) // m) * m


# ----------------------------- Pallas kernel --------------------------------
def vibi_kernel(x_ref, w1_ref, w2a_ref, w2b_ref, bias_ref, z_ref, y2_ref):
    """One batch-tile of VIBI forward (mode='distribution').

    explainer     : z  = x @ w1 + b1
    approximator2 : y2 = relu(z @ w2a + b2a) @ w2b + b2b
    All operands are pre-padded to lane-dense widths; zero padding is exact.
    """
    zp = w1_ref.shape[1]
    hp = w2a_ref.shape[1]
    ncp = w2b_ref.shape[1]

    b1 = bias_ref[0:1, :zp]      # (1, zp)  f32
    b2a = bias_ref[1:2, :hp]     # (1, hp)  f32
    b2b = bias_ref[2:3, :ncp]    # (1, ncp) f32

    x = x_ref[...]               # (TM, DP) bf16

    # explainer: logits_z = x @ W1 + b1   (f32 accumulation on the MXU)
    z = jnp.dot(x, w1_ref[...], preferred_element_type=jnp.float32) + b1
    z_ref[...] = z.astype(z_ref.dtype)

    # approximator2: Linear -> ReLU -> Linear
    h = jnp.dot(z.astype(w2a_ref.dtype), w2a_ref[...],
                preferred_element_type=jnp.float32) + b2a
    h = jnp.maximum(h, 0.0)
    y2 = jnp.dot(h.astype(w2b_ref.dtype), w2b_ref[...],
                 preferred_element_type=jnp.float32) + b2b
    y2_ref[...] = y2.astype(y2_ref.dtype)


# ------------------------------- wrapper -------------------------------------
def vibi_forward_distribution(x_nchw, params, *, compute_dtype=jnp.bfloat16):
    """Runs VIBI.forward(x, mode='distribution') -> (logits_z_flat, logits_y2)."""
    B, C, H, W = x_nchw.shape
    D = C * H * W
    # Glue: flatten NCHW row-major, identical to torch x.view(B, -1).
    x_flat = x_nchw.reshape(B, D)

    w1, b1 = params["w1"], params["b1"]
    w2a, b2a = params["w2a"], params["b2a"]
    w2b, b2b = params["w2b"], params["b2b"]
    Z, Hd, NC = w1.shape[1], w2a.shape[1], w2b.shape[1]

    # ---- lane / sublane padding (zero padding keeps the linears exact) ----
    DP = _round_up(D, LANE)
    ZP = _round_up(Z, LANE)
    HP = _round_up(Hd, LANE)
    NCP = _round_up(NC, LANE)
    BW = max(ZP, HP, NCP)                    # shared width for the bias slab

    B_min = _round_up(max(B, SUBLANE), SUBLANE)
    TM = min(B_min, 256)                     # batch tile (rows per grid step)
    B_pad = _round_up(B_min, TM)
    grid = (B_pad // TM,)

    def pad2(a, rows, cols):
        return jnp.pad(a, ((0, rows - a.shape[0]), (0, cols - a.shape[1])))

    x_p = pad2(x_flat, B_pad, DP).astype(compute_dtype)
    w1_p = pad2(w1, DP, ZP).astype(compute_dtype)
    w2a_p = pad2(w2a, ZP, HP).astype(compute_dtype)
    w2b_p = pad2(w2b, HP, NCP).astype(compute_dtype)
    # single consolidated bias operand (one small DMA instead of three)
    bias_p = jnp.concatenate(
        [pad2(b1, 1, BW), pad2(b2a, 1, BW), pad2(b2b, 1, BW)], axis=0
    ).astype(jnp.float32)                    # (3, BW)

    flops = 2 * B_pad * (DP * ZP + ZP * HP + HP * NCP)
    bytes_accessed = (
        x_p.size * x_p.dtype.itemsize
        + w1_p.size * w1_p.dtype.itemsize
        + w2a_p.size * w2a_p.dtype.itemsize
        + w2b_p.size * w2b_p.dtype.itemsize
        + bias_p.size * 4
        + B_pad * (ZP + NCP) * 4
    )

    out_z_p, out_y2_p = pl.pallas_call(
        vibi_kernel,
        out_shape=(
            jax.ShapeDtypeStruct((B_pad, ZP), jnp.float32),
            jax.ShapeDtypeStruct((B_pad, NCP), jnp.float32),
        ),
        grid=grid,
        in_specs=[
            pl.BlockSpec((TM, DP), lambda i: (i, 0)),     # x batch tile
            pl.BlockSpec((DP, ZP), lambda i: (0, 0)),     # w1 (VMEM-resident)
            pl.BlockSpec((ZP, HP), lambda i: (0, 0)),     # w2a
            pl.BlockSpec((HP, NCP), lambda i: (0, 0)),    # w2b
            pl.BlockSpec((3, BW), lambda i: (0, 0)),      # biases (consolidated)
        ],
        out_specs=(
            pl.BlockSpec((TM, ZP), lambda i: (i, 0)),     # lane-dense z
            pl.BlockSpec((TM, NCP), lambda i: (i, 0)),    # lane-dense y2
        ),
        compiler_params=pltpu.CompilerParams(
            dimension_semantics=("parallel",),   # v7x: shard batch tiles over both TCs
        ),
        cost_estimate=pl.CostEstimate(
            flops=flops, transcendentals=0, bytes_accessed=bytes_accessed),
    )(x_p, w1_p, w2a_p, w2b_p, bias_p)

    # slice padded lanes / batch rows back off
    return out_z_p[:B, :Z], out_y2_p[:B, :NC]


# ---------------------- deterministic parameter init ------------------------
def init_params(key, in_dim, z_dim, hid_dim, num_classes):
    """PyTorch nn.Linear-style uniform(-1/sqrt(fan_in), 1/sqrt(fan_in)) init."""
    ks = jax.random.split(key, 6)

    def lin(kw, kb, fan_in, fan_out):
        bound = 1.0 / jnp.sqrt(jnp.float32(fan_in))
        w = jax.random.uniform(kw, (fan_in, fan_out), jnp.float32, -bound, bound)
        b = jax.random.uniform(kb, (1, fan_out), jnp.float32, -bound, bound)
        return w, b

    w1, b1 = lin(ks[0], ks[1], in_dim, z_dim)            # explainer
    w2a, b2a = lin(ks[2], ks[3], z_dim, hid_dim)          # approximator2 layer 1
    w2b, b2b = lin(ks[4], ks[5], hid_dim, num_classes)    # approximator2 layer 2
    return {"w1": w1, "b1": b1, "w2a": w2a, "b2a": b2a, "w2b": w2b, "b2b": b2b}


# --------------------------- pure-JAX reference ------------------------------
def vibi_reference(x_nchw, params):
    B = x_nchw.shape[0]
    x = x_nchw.reshape(B, -1)
    z = x @ params["w1"] + params["b1"]
    h = jnp.maximum(z @ params["w2a"] + params["b2a"], 0.0)
    y2 = h @ params["w2b"] + params["b2b"]
    return z, y2


if __name__ == "__main__":
    key = jax.random.PRNGKey(0)
    k_x, k_p = jax.random.split(key)

    # Small MNIST-like synthetic input: batch=2, channels=4, spatial=16x16 (NCHW)
    B, C, H, W = 2, 4, 16, 16
    Z_DIM, HID, NUM_CLASSES = 32, 32, 10

    x = jax.random.normal(k_x, (B, C, H, W), dtype=jnp.float32)
    params = init_params(k_p, C * H * W, Z_DIM, HID, NUM_CLASSES)

    logits_z, logits_y2 = vibi_forward_distribution(x, params)
    jax.block_until_ready((logits_z, logits_y2))

    # correctness check against pure-JAX f32 reference.
    # Tolerance is loosened because the kernel uses bf16 operands with f32
    # accumulation (per performance review).
    ref_z, ref_y2 = vibi_reference(x, params)
    assert logits_z.shape == (B, Z_DIM) and logits_y2.shape == (B, NUM_CLASSES)
    assert jnp.allclose(logits_z, ref_z, atol=3e-2, rtol=3e-2)
    assert jnp.allclose(logits_y2, ref_y2, atol=3e-2, rtol=3e-2)

    print("KERNEL_OK")
</pallas_src>

<mosaic_0001>
module attributes {stable_mosaic.version = 11 : i64} {
  func.func @vibi_kernel(%arg0: i32, %arg1: memref<16x1024xbf16, #tpu.memory_space<vmem>>, %arg2: memref<1024x128xbf16, #tpu.memory_space<vmem>>, %arg3: memref<128x128xbf16, #tpu.memory_space<vmem>>, %arg4: memref<128x128xbf16, #tpu.memory_space<vmem>>, %arg5: memref<3x128xf32, #tpu.memory_space<vmem>>, %arg6: memref<16x128xf32, #tpu.memory_space<vmem>>, %arg7: memref<16x128xf32, #tpu.memory_space<vmem>>) attributes {dimension_semantics = [#tpu.dimension_semantics<parallel>], iteration_bounds = array<i64: 1>, scalar_prefetch = 0 : i64, scratch_operands = 0 : i64, tpu.core_type = #tpu.core_type<tc>, window_params = [{transform_indices = @transform_0, window_bounds = array<i64: 16, 1024>}, {pipeline_mode = #tpu.pipeline_mode<synchronous>, transform_indices = @transform_1, window_bounds = array<i64: 1024, 128>}, {pipeline_mode = #tpu.pipeline_mode<synchronous>, transform_indices = @transform_2, window_bounds = array<i64: 128, 128>}, {pipeline_mode = #tpu.pipeline_mode<synchronous>, transform_indices = @transform_3, window_bounds = array<i64: 128, 128>}, {pipeline_mode = #tpu.pipeline_mode<synchronous>, transform_indices = @transform_4, window_bounds = array<i64: 3, 128>}, {transform_indices = @transform_5, window_bounds = array<i64: 16, 128>}, {transform_indices = @transform_6, window_bounds = array<i64: 16, 128>}]} {
    %c0 = arith.constant 0 : index
    %c0_0 = arith.constant 0 : index
    %0 = vector.load %arg5[%c0, %c0_0] : memref<3x128xf32, #tpu.memory_space<vmem>>, vector<1x128xf32>
    %c1 = arith.constant 1 : index
    %c0_1 = arith.constant 0 : index
    %1 = vector.load %arg5[%c1, %c0_1] : memref<3x128xf32, #tpu.memory_space<vmem>>, vector<1x128xf32>
    %c2 = arith.constant 2 : index
    %c0_2 = arith.constant 0 : index
    %2 = vector.load %arg5[%c2, %c0_2] : memref<3x128xf32, #tpu.memory_space<vmem>>, vector<1x128xf32>
    %c0_3 = arith.constant 0 : index
    %c0_4 = arith.constant 0 : index
    %3 = vector.load %arg1[%c0_3, %c0_4] : memref<16x1024xbf16, #tpu.memory_space<vmem>>, vector<16x1024xbf16>
    %c0_5 = arith.constant 0 : index
    %c0_6 = arith.constant 0 : index
    %4 = vector.load %arg2[%c0_5, %c0_6] : memref<1024x128xbf16, #tpu.memory_space<vmem>>, vector<1024x128xbf16>
    %cst = arith.constant dense<0.000000e+00> : vector<16x128xf32>
    %5 = tpu.matmul %3, %4, %cst {dimension_numbers = #tpu.dot_dimension_numbers<[1], [0], [0], [1], [0, 0, 1, 1], [], []>} : vector<16x1024xbf16>, vector<1024x128xbf16>, vector<16x128xf32> -> vector<16x128xf32>
    %6 = vector.broadcast %0 : vector<1x128xf32> to vector<16x128xf32>
    %7 = arith.addf %5, %6 : vector<16x128xf32>
    %c0_7 = arith.constant 0 : index
    %c0_8 = arith.constant 0 : index
    %8 = vector.load %arg6[%c0_7, %c0_8] : memref<16x128xf32, #tpu.memory_space<vmem>>, vector<16x128xf32>
    tpu.vector_store %arg6[%c0_7, %c0_8], %7 {strides = array<i32>} : memref<16x128xf32, #tpu.memory_space<vmem>>, vector<16x128xf32>,
    %9 = arith.truncf %7 : vector<16x128xf32> to vector<16x128xbf16>
    %c0_9 = arith.constant 0 : index
    %c0_10 = arith.constant 0 : index
    %10 = vector.load %arg3[%c0_9, %c0_10] : memref<128x128xbf16, #tpu.memory_space<vmem>>, vector<128x128xbf16>
    %cst_11 = arith.constant dense<0.000000e+00> : vector<16x128xf32>
    %11 = tpu.matmul %9, %10, %cst_11 {dimension_numbers = #tpu.dot_dimension_numbers<[1], [0], [0], [1], [0, 0, 1, 1], [], []>} : vector<16x128xbf16>, vector<128x128xbf16>, vector<16x128xf32> -> vector<16x128xf32>
    %12 = vector.broadcast %1 : vector<1x128xf32> to vector<16x128xf32>
    %13 = arith.addf %11, %12 : vector<16x128xf32>
    %cst_12 = arith.constant 0.000000e+00 : f32
    %14 = vector.broadcast %cst_12 : f32 to vector<16x128xf32>
    %15 = arith.maximumf %13, %14 : vector<16x128xf32>
    %16 = arith.truncf %15 : vector<16x128xf32> to vector<16x128xbf16>
    %c0_13 = arith.constant 0 : index
    %c0_14 = arith.constant 0 : index
    %17 = vector.load %arg4[%c0_13, %c0_14] : memref<128x128xbf16, #tpu.memory_space<vmem>>, vector<128x128xbf16>
    %cst_15 = arith.constant dense<0.000000e+00> : vector<16x128xf32>
    %18 = tpu.matmul %16, %17, %cst_15 {dimension_numbers = #tpu.dot_dimension_numbers<[1], [0], [0], [1], [0, 0, 1, 1], [], []>} : vector<16x128xbf16>, vector<128x128xbf16>, vector<16x128xf32> -> vector<16x128xf32>
    %19 = vector.broadcast %2 : vector<1x128xf32> to vector<16x128xf32>
    %20 = arith.addf %18, %19 : vector<16x128xf32>
    %c0_16 = arith.constant 0 : index
    %c0_17 = arith.constant 0 : index
    %21 = vector.load %arg7[%c0_16, %c0_17] : memref<16x128xf32, #tpu.memory_space<vmem>>, vector<16x128xf32>
    tpu.vector_store %arg7[%c0_16, %c0_17], %20 {strides = array<i32>} : memref<16x128xf32, #tpu.memory_space<vmem>>, vector<16x128xf32>,
    return
  }
  func.func @transform_0(%arg0: i32) -> (i32, i32) {
    %c0_i32 = arith.constant 0 : i32
    %c0_i32_0 = arith.constant 0 : i32
    return %arg0, %c0_i32 : i32, i32
  }
  func.func @transform_1(%arg0: i32) -> (i32, i32) {
    %c0_i32 = arith.constant 0 : i32
    %c0_i32_0 = arith.constant 0 : i32
    %c0_i32_1 = arith.constant 0 : i32
    return %c0_i32, %c0_i32_0 : i32, i32
  }
  func.func @transform_2(%arg0: i32) -> (i32, i32) {
    %c0_i32 = arith.constant 0 : i32
    %c0_i32_0 = arith.constant 0 : i32
    %c0_i32_1 = arith.constant 0 : i32
    return %c0_i32, %c0_i32_0 : i32, i32
  }
  func.func @transform_3(%arg0: i32) -> (i32, i32) {
    %c0_i32 = arith.constant 0 : i32
    %c0_i32_0 = arith.constant 0 : i32
    %c0_i32_1 = arith.constant 0 : i32
    return %c0_i32, %c0_i32_0 : i32, i32
  }
  func.func @transform_4(%arg0: i32) -> (i32, i32) {
    %c0_i32 = arith.constant 0 : i32
    %c0_i32_0 = arith.constant 0 : i32
    %c0_i32_1 = arith.constant 0 : i32
    return %c0_i32, %c0_i32_0 : i32, i32
  }
  func.func @transform_5(%arg0: i32) -> (i32, i32) {
    %c0_i32 = arith.constant 0 : i32
    %c0_i32_0 = arith.constant 0 : i32
    return %arg0, %c0_i32 : i32, i32
  }
  func.func @transform_6(%arg0: i32) -> (i32, i32) {
    %c0_i32 = arith.constant 0 : i32
    %c0_i32_0 = arith.constant 0 : i32
    return %arg0, %c0_i32 : i32, i32
  }
}

</mosaic_0001>

<bundles_post_ra>
// kernel: tpu_custom_call.1
= control target key start
LH: loop header
LB: loop body
LE: loop exit
PB: predicated region body
PF: predicated region fallthrough
CT: control target
= control target key end

     0   :  { %12 = vsyncpa [#allocation3], 0  ;;  %s1715_s0 = inlined_call_operand.hbm [shape: bf16[16,1024], index: 0, kind: input, shape index: {}]   ;;  %s1716_s1 = inlined_call_operand.hbm [shape: bf16[1024,128], index: 1, kind: input, shape index: {}]   ;;  %s1717_s2 = inlined_call_operand.hbm [shape: bf16[128,128], index: 2, kind: input, shape index: {}]   ;;  %s1718_s3 = inlined_call_operand.hbm [shape: bf16[128,128], index: 3, kind: input, shape index: {}]   ;;  %s1719_s4 = inlined_call_operand.vmem [shape: f32[3,128], index: 4, kind: input, shape index: {}]   ;;  %s1720_s5 = inlined_call_operand.hbm [shape: f32[16,128], index: 5, kind: output, shape index: {0}]   ;;  %s1721_s6 = inlined_call_operand.hbm [shape: f32[16,128], index: 6, kind: output, shape index: {1}]  }
   0x1   :  { %13 = vsyncpa [#allocation6], 0 }
   0x2   :  { %14 = vsyncpa [#allocation9], 0 }
   0x3   :  { %15 = vsyncpa [#allocation4], 0 }
   0x4   :  { %16 = vsyncpa [#allocation12], 0  ;;  %s1545_s21 = smov [#allocation5]   ;;  %s1403_s25 = scalar_lea.hbm %s1716_s1, 8192 }
   0x5   :  { %s34_s22 = sshll.u32 %s1545_s21, 4  ;;  %p1404_p0 = scmp.ne.s32.totalorder %s1716_s1, %s1403_s25  ;;  %s35_s22 = int_to_ptr.vmem [resolvable:$true] %s34_s22 }
   0x6   :  { %p1407_p1 = scmp.lt.u32.totalorder %s1403_s25, %s1716_s1 }
   0x8   :  { %p1409_p2 = pnand %p1407_p1, %p1404_p0 }
   0xa   :  { %1412 = shalt.err (!%p1409_p2)
}
   0xb   :  { %s1413_s30 = scalar_lea.vmem %s35_s22, 8192  ;;  %p1418_p4 = scmp.lt.s32.totalorder %s35_s22, %s35_s22 }
   0xc   :  { %p1414_p3 = scmp.ne.s32.totalorder %s35_s22, %s1413_s30  ;;  %p1419_p5 = scmp.lt.s32.totalorder %s1413_s30, %s1413_s30 }
   0xe   :  { %p1420_p6 = por %p1419_p5, %p1418_p4 }
  0x10   :  { %p1421_p7 = pnand %p1420_p6, %p1414_p3 }
  0x12   :  { %1424 = shalt.err (!%p1421_p7)
}
  0x13   :  { %s1546_s7 = smov 64   ;;  %s1547_s8 = smov 4  }
  0x14   :  { %40 = dma.hbm_to_vmem [thread:$0]  %s1716_s1, 8192, %s35_s22, [#allocation6], %s1546_s7, %s1546_s7, %s1547_s8  }
  0x15   :  { %s1548_s11 = smov [#allocation2]   ;;  %s1425_s15 = scalar_lea.hbm %s1715_s0, 1024 }
  0x16   :  { %s22_s12 = sshll.u32 %s1548_s11, 4  ;;  %p1426_p8 = scmp.ne.s32.totalorder %s1715_s0, %s1425_s15  ;;  %s23_s12 = int_to_ptr.vmem [resolvable:$true] %s22_s12 }
  0x17   :  { %p1429_p9 = scmp.lt.u32.totalorder %s1425_s15, %s1715_s0 }
  0x19   :  { %p1431_p10 = pnand %p1429_p9, %p1426_p8 }
  0x1b   :  { %1434 = shalt.err (!%p1431_p10)
}
  0x1c   :  { %s1435_s20 = scalar_lea.vmem %s23_s12, 1024  ;;  %p1440_p12 = scmp.lt.s32.totalorder %s23_s12, %s23_s12 }
  0x1d   :  { %p1436_p11 = scmp.ne.s32.totalorder %s23_s12, %s1435_s20  ;;  %p1441_p13 = scmp.lt.s32.totalorder %s1435_s20, %s1435_s20 }
  0x1f   :  { %p1442_p0 = por %p1441_p13, %p1440_p12 }
  0x21   :  { %p1443_p1 = pnand %p1442_p0, %p1436_p11 }
  0x23   :  { %1446 = shalt.err (!%p1443_p1)
}
  0x24   :  { %s1549_s1 = smov 512   ;;  %s1550_s21 = smov 32  }
  0x25   :  { %28 = dma.hbm_to_vmem [thread:$0]  %s1715_s0, 1024, %s23_s12, [#allocation3], %s1549_s1, %s1549_s1, %s1550_s21  }
  0x26   :  { %s1551_s24 = smov [#allocation7]   ;;  %s1552_s26 = smov [#allocation8]  }
  0x27   :  { %s46_s25 = sshll.u32 %s1551_s24, 4  ;;  %s58_s27 = sshll.u32 %s1552_s26, 4  ;;  %s47_s25 = int_to_ptr.vmem [resolvable:$true] %s46_s25  ;;  %s1621_s27 = int_to_ptr.vmem [resolvable:$true] %s58_s27 }
  0x28   :  { %s1447_s30 = scalar_lea.hbm %s1717_s2, 1024 }
  0x29   :  { %p1448_p2 = scmp.ne.s32.totalorder %s1717_s2, %s1447_s30  ;;  %p1451_p3 = scmp.lt.u32.totalorder %s1447_s30, %s1717_s2 }
  0x2b   :  { %p1453_p4 = pnand %p1451_p3, %p1448_p2 }
  0x2d   :  { %1456 = shalt.err (!%p1453_p4)
}
  0x2e   :  { %s1457_s0 = scalar_lea.vmem %s47_s25, 1024  ;;  %p1462_p6 = scmp.lt.s32.totalorder %s47_s25, %s47_s25 }
  0x2f   :  { %p1458_p5 = scmp.ne.s32.totalorder %s47_s25, %s1457_s0  ;;  %p1463_p7 = scmp.lt.s32.totalorder %s1457_s0, %s1457_s0 }
  0x31   :  { %p1464_p8 = por %p1463_p7, %p1462_p6 }
  0x33   :  { %p1465_p9 = pnand %p1464_p8, %p1458_p5 }
  0x35   :  { %1468 = shalt.err (!%p1465_p9)
}
  0x36   :  { %52 = dma.hbm_to_vmem [thread:$0]  %s1717_s2, 1024, %s47_s25, [#allocation6], %s1546_s7, %s1546_s7, %s1547_s8  }
  0x37   :  { %s1469_s17 = scalar_lea.hbm %s1718_s3, 1024 }
  0x38   :  { %p1470_p10 = scmp.ne.s32.totalorder %s1718_s3, %s1469_s17  ;;  %p1473_p11 = scmp.lt.u32.totalorder %s1469_s17, %s1718_s3 }
  0x3a   :  { %p1475_p12 = pnand %p1473_p11, %p1470_p10 }
  0x3c   :  { %1478 = shalt.err (!%p1475_p12)
}
  0x3d   :  { %s1479_s21 = scalar_lea.vmem %s1621_s27, 1024  ;;  %p1484_p0 = scmp.lt.s32.totalorder %s1621_s27, %s1621_s27 }
  0x3e   :  { %p1480_p13 = scmp.ne.s32.totalorder %s1621_s27, %s1479_s21  ;;  %p1485_p1 = scmp.lt.s32.totalorder %s1479_s21, %s1479_s21 }
  0x40   :  { %p1486_p2 = por %p1485_p1, %p1484_p0 }
  0x42   :  { %p1487_p3 = pnand %p1486_p2, %p1480_p13 }
  0x44   :  { %1490 = shalt.err (!%p1487_p3)
}
  0x45   :  { %64 = dma.hbm_to_vmem [thread:$0]  %s1718_s3, 1024, %s1621_s27, [#allocation9], %s1546_s7, %s1546_s7, %s1547_s8  }
  0x46   :  { %1535 = dma.done.wait [#allocation3], 1024  }
  0x47   :  { %1536 = vsyncadd [#allocation3], 4294966272 }
  0x48   :  { %1537 = dma.done.wait [#allocation6], 9216  }
  0x49   :  { %1538 = vsyncadd [#allocation6], 4294958080 }
  0x4a   :  { %1539 = dma.done.wait [#allocation9], 1024  }
  0x4b   :  { %1540 = vsyncadd [#allocation9], 4294966272  ;;  %v1323_v0 = vld [vmem:[#allocation5 + $0x40] sm:$0xff]   ;;  %v1327_v4 = vld [vmem:[#allocation5 + $0x48] sm:$0xff]   ;;  %vm1554_vm0 = vmmov 0   ;;  %s1555_s24 = smov [#allocation10]  }
  0x4c   :  { %v1324_v1 = vld [vmem:[#allocation5 + $0xc0] sm:$0xff]   ;;  %1163 = vmatprep.subr.bf16.mxu0 %v1323_v0  ;;  %v1328_v5 = vld [vmem:[#allocation5 + $0xc8] sm:$0xff]   ;;  %v1331_v8 = vld [vmem:[#allocation5 + $0x50] sm:$0xff]   ;;  %s1042_s25 = sshll.u32 %s1555_s24, 4  ;;  %s1043_s25 = int_to_ptr.vmem [resolvable:$true] %s1042_s25 }
  0x4d   :  { %v1325_v2 = vld [vmem:[#allocation5] sm:$0xff]   ;;  %1185 = vmatprep.subr.bf16.mxu1 %v1324_v1  ;;  %v1329_v6 = vld [vmem:[#allocation5 + $0x8] sm:$0xff]   ;;  %v1332_v9 = vld [vmem:[#allocation5 + $0xd0] sm:$0xff]   ;;  %s1491_s26 = scalar_lea.vmem %s1043_s25, 256  ;;  %p1496_p5 = scmp.lt.s32.totalorder %s1043_s25, %s1043_s25 }
  0x4e   :  { %v1326_v3 = vld [vmem:[#allocation5 + $0x80] sm:$0xff]   ;;  %1164 = vmatpush3.bf16.msra.mxu0 %v1325_v2  ;;  %v1330_v7 = vld [vmem:[#allocation5 + $0x88] sm:$0xff]   ;;  %v1333_v10 = vld [vmem:[#allocation5 + $0x10] sm:$0xff]   ;;  %p1492_p4 = scmp.ne.s32.totalorder %s1043_s25, %s1491_s26  ;;  %p1497_p6 = scmp.lt.s32.totalorder %s1491_s26, %s1491_s26 }
  0x4f   :  { %1186 = vmatpush3.bf16.msra.mxu1 %v1326_v3  ;;  %1165 = vmatprep.subr.bf16.mxu0 %v1327_v4  ;;  %v1334_v11 = vld [vmem:[#allocation5 + $0x90] sm:$0xff]   ;;  %v1335_v12 = vld [vmem:[#allocation5 + $0x58] sm:$0xff]   ;;  %v1339_v16 = vld [vmem:[#allocation5 + $0x60] sm:$0xff]  }
  0x50   :  { %1187 = vmatprep.subr.bf16.mxu1 %v1328_v5  ;;  %v1336_v13 = vld [vmem:[#allocation5 + $0xd8] sm:$0xff]   ;;  %v1340_v17 = vld [vmem:[#allocation5 + $0xe0] sm:$0xff]   ;;  %v1343_v20 = vld [vmem:[#allocation5 + $0x68] sm:$0xff]   ;;  %p1498_p7 = por %p1497_p6, %p1496_p5 }
  0x51   :  { %v1337_v14 = vld [vmem:[#allocation5 + $0x18] sm:$0xff]   ;;  %v1341_v18 = vld [vmem:[#allocation5 + $0x20] sm:$0xff]   ;;  %v1344_v21 = vld [vmem:[#allocation5 + $0xe8] sm:$0xff]  }
  0x52   :  { %1166 = vmatpush3.bf16.msra.mxu0 %v1329_v6  ;;  %v1338_v15 = vld [vmem:[#allocation5 + $0x98] sm:$0xff]   ;;  %v1342_v19 = vld [vmem:[#allocation5 + $0xa0] sm:$0xff]   ;;  %v1345_v22 = vld [vmem:[#allocation5 + $0x28] sm:$0xff]   ;;  %p1499_p8 = pnand %p1498_p7, %p1492_p4 }
  0x53   :  { %1188 = vmatpush3.bf16.msra.mxu1 %v1330_v7  ;;  %1167 = vmatprep.subr.bf16.mxu0 %v1331_v8  ;;  %v1346_v23 = vld [vmem:[#allocation5 + $0xa8] sm:$0xff]   ;;  %v1347_v24 = vld [vmem:[#allocation5 + $0x70] sm:$0xff]   ;;  %v1351_v28 = vld [vmem:[#allocation5 + $0x78] sm:$0xff]  }
  0x54   :  { %1189 = vmatprep.subr.bf16.mxu1 %v1332_v9  ;;  %v1348_v25 = vld [vmem:[#allocation5 + $0xf0] sm:$0xff]   ;;  %v1352_v29 = vld [vmem:[#allocation5 + $0xf8] sm:$0xff]   ;;  %v83_v32 = vld [vmem:[#allocation2] sm:$0xff] }
  0x55   :  { %v1349_v26 = vld [vmem:[#allocation5 + $0x30] sm:$0xff]   ;;  %v1353_v30 = vld [vmem:[#allocation5 + $0x38] sm:$0xff]   ;;  %v87_v33 = vld [vmem:[#allocation2 + $0x20] sm:$0xff] }
  0x56   :  { %1168 = vmatpush3.bf16.msra.mxu0 %v1333_v10  ;;  %v1350_v27 = vld [vmem:[#allocation5 + $0xb0] sm:$0xff]   ;;  %v1354_v31 = vld [vmem:[#allocation5 + $0xb8] sm:$0xff]   ;;  %v84_v34 = vld [vmem:[#allocation2 + $0x8] sm:$0xff]  ;;  %v1073_v35 = vcombine.low %v83_v32, %v87_v33  ;;  %v1074_v36 = vcombine.high %v83_v32, %v87_v33 }
  0x57   :  { %1190 = vmatpush3.bf16.msra.mxu1 %v1334_v11  ;;  %1169 = vmatprep.subr.bf16.mxu0 %v1335_v12  ;;  %v88_v37 = vld [vmem:[#allocation2 + $0x28] sm:$0xff]  ;;  %v1355_v40 = vld [vmem:[#allocation5 + $0x140] sm:$0xff]   ;;  %v1363_v48 = vld [vmem:[#allocation5 + $0x150] sm:$0xff]  }
  0x58   :  { %1191 = vmatprep.subr.bf16.mxu1 %v1336_v13  ;;  %v1075_v38 = vcombine.low %v84_v34, %v88_v37  ;;  %v1076_v39 = vcombine.high %v84_v34, %v88_v37  ;;  %679 = vmatprep.mubr.bf16.mxu0 %v1074_v36  ;;  %v1356_v41 = vld [vmem:[#allocation5 + $0x1c0] sm:$0xff]   ;;  %v1359_v44 = vld [vmem:[#allocation5 + $0x148] sm:$0xff]   ;;  %v1364_v49 = vld [vmem:[#allocation5 + $0x1d0] sm:$0xff]  }
  0x59   :  { %v1357_v42 = vld [vmem:[#allocation5 + $0x100] sm:$0xff]   ;;  %v1360_v45 = vld [vmem:[#allocation5 + $0x1c8] sm:$0xff]   ;;  %v1365_v50 = vld [vmem:[#allocation5 + $0x110] sm:$0xff]  }
  0x5a   :  { %1170 = vmatpush3.bf16.msra.mxu0 %v1337_v14  ;;  %720 = vmatprep.mubr.bf16.mxu1 %v1076_v39  ;;  %v1358_v43 = vld [vmem:[#allocation5 + $0x180] sm:$0xff]   ;;  %v1361_v46 = vld [vmem:[#allocation5 + $0x108] sm:$0xff]   ;;  %v1366_v51 = vld [vmem:[#allocation5 + $0x190] sm:$0xff]  }
  0x5b   :  { %1192 = vmatpush3.bf16.msra.mxu1 %v1338_v15  ;;  %1171 = vmatprep.subr.bf16.mxu0 %v1339_v16  ;;  %v1362_v47 = vld [vmem:[#allocation5 + $0x188] sm:$0xff]   ;;  %v1367_v52 = vld [vmem:[#allocation5 + $0x158] sm:$0xff]   ;;  %v1371_v56 = vld [vmem:[#allocation5 + $0x160] sm:$0xff]  }
  0x5c   :  { %1193 = vmatprep.subr.bf16.mxu1 %v1340_v17  ;;  %v1368_v53 = vld [vmem:[#allocation5 + $0x1d8] sm:$0xff]   ;;  %v1372_v57 = vld [vmem:[#allocation5 + $0x1e0] sm:$0xff]   ;;  %v1375_v60 = vld [vmem:[#allocation5 + $0x168] sm:$0xff]   ;;  %v1553_v17 = vmov 0.0  }
  0x5d   :  { %v1369_v54 = vld [vmem:[#allocation5 + $0x118] sm:$0xff]   ;;  %v1373_v58 = vld [vmem:[#allocation5 + $0x120] sm:$0xff]   ;;  %v1376_v61 = vld [vmem:[#allocation5 + $0x1e8] sm:$0xff]  }
  0x5e   :  { %1172 = vmatpush3.bf16.msra.mxu0 %v1341_v18  ;;  %v1370_v55 = vld [vmem:[#allocation5 + $0x198] sm:$0xff]   ;;  %v1374_v59 = vld [vmem:[#allocation5 + $0x1a0] sm:$0xff]   ;;  %v1377_v62 = vld [vmem:[#allocation5 + $0x128] sm:$0xff]  }
  0x5f   :  { %1194 = vmatpush3.bf16.msra.mxu1 %v1342_v19  ;;  %1173 = vmatprep.subr.bf16.mxu0 %v1343_v20  ;;  %v1378_v63 = vld [vmem:[#allocation5 + $0x1a8] sm:$0xff]   ;;  %v1379_v0 = vld [vmem:[#allocation5 + $0x170] sm:$0xff]   ;;  %v1383_v4 = vld [vmem:[#allocation5 + $0x178] sm:$0xff]  }
  0x60   :  { %1195 = vmatprep.subr.bf16.mxu1 %v1344_v21  ;;  %v1380_v1 = vld [vmem:[#allocation5 + $0x1f0] sm:$0xff]   ;;  %v1384_v5 = vld [vmem:[#allocation5 + $0x1f8] sm:$0xff]   ;;  %v1387_v16 = vld [vmem:[#allocation7] sm:$0xff]  }
  0x61   :  { %v1381_v2 = vld [vmem:[#allocation5 + $0x130] sm:$0xff]   ;;  %v1385_v6 = vld [vmem:[#allocation5 + $0x138] sm:$0xff]   ;;  %v1388_v18 = vld [vmem:[#allocation7 + $0x8] sm:$0xff]  }
  0x62   :  { %1174 = vmatpush3.bf16.msra.mxu0 %v1345_v22  ;;  %v1382_v3 = vld [vmem:[#allocation5 + $0x1b0] sm:$0xff]   ;;  %v1386_v7 = vld [vmem:[#allocation5 + $0x1b8] sm:$0xff]   ;;  %v1391_v21 = vld [vmem:[#allocation7 + $0x20] sm:$0xff]  }
  0x63   :  { %1196 = vmatpush3.bf16.msra.mxu1 %v1346_v23  ;;  %1175 = vmatprep.subr.bf16.mxu0 %v1347_v24  ;;  %v85_v8 = vld [vmem:[#allocation2 + $0x10] sm:$0xff]  ;;  %v86_v12 = vld [vmem:[#allocation2 + $0x18] sm:$0xff]  ;;  %v1392_v22 = vld [vmem:[#allocation7 + $0x28] sm:$0xff]  }
  0x64   :  { %1197 = vmatprep.subr.bf16.mxu1 %v1348_v25  ;;  %v89_v9 = vld [vmem:[#allocation2 + $0x30] sm:$0xff]  ;;  %v90_v13 = vld [vmem:[#allocation2 + $0x38] sm:$0xff]  ;;  %v1395_v25 = vld [vmem:[#allocation8] sm:$0xff]  }
  0x65   :  { %v1077_v10 = vcombine.low %v85_v8, %v89_v9  ;;  %v1078_v11 = vcombine.high %v85_v8, %v89_v9  ;;  %v1079_v14 = vcombine.low %v86_v12, %v90_v13  ;;  %v1080_v15 = vcombine.high %v86_v12, %v90_v13  ;;  %v1389_v19 = vld [vmem:[#allocation7 + $0x10] sm:$0xff]   ;;  %v1390_v20 = vld [vmem:[#allocation7 + $0x18] sm:$0xff]   ;;  %v1072_v33 = vld [vmem:[%s1719_s4] ss:$0 sm:$0xff] }
  0x66   :  { %1176 = vmatpush3.bf16.msra.mxu0 %v1349_v26  ;;  %v1393_v23 = vld [vmem:[#allocation7 + $0x30] sm:$0xff]   ;;  %v1394_v24 = vld [vmem:[#allocation7 + $0x38] sm:$0xff]   ;;  %v1396_v26 = vld [vmem:[#allocation8 + $0x8] sm:$0xff]  }
  0x67   :  { %1198 = vmatpush3.bf16.msra.mxu1 %v1350_v27  ;;  %1177 = vmatprep.subr.bf16.mxu0 %v1351_v28  ;;  %v1397_v27 = vld [vmem:[#allocation8 + $0x10] sm:$0xff]   ;;  %v1398_v28 = vld [vmem:[#allocation8 + $0x18] sm:$0xff]  }
  0x68   :  { %1199 = vmatprep.subr.bf16.mxu1 %v1352_v29  ;;  %v1399_v29 = vld [vmem:[#allocation8 + $0x20] sm:$0xff]  }
  0x6a   :  { %1178 = vmatpush3.bf16.msra.mxu0 %v1353_v30  ;;  %v1400_v30 = vld [vmem:[#allocation8 + $0x28] sm:$0xff]  }
  0x6b   :  { %1200 = vmatpush3.bf16.msra.mxu1 %v1354_v31  ;;  %1207 = vmatprep.subr.bf16.mxu0 %v1355_v40 }
  0x6c   :  { %1229 = vmatprep.subr.bf16.mxu1 %v1356_v41 }
  0x6d   :  { %680 = vmatmul.mubr.bf16.vlgmr.msra.gmra.mrb[0].mxu0 %v1073_v35 }
  0x6e   :  { %721 = vmatmul.mubr.bf16.vlgmr.msra.gmra.mrb[0].mxu1 %v1075_v38  ;;  %1208 = vmatpush3.bf16.msra.mxu0 %v1357_v42 }
  0x6f   :  { %1230 = vmatpush3.bf16.msra.mxu1 %v1358_v43  ;;  %1209 = vmatprep.subr.bf16.mxu0 %v1359_v44 }
  0x70   :  { %1231 = vmatprep.subr.bf16.mxu1 %v1360_v45  ;;  %761 = vmatprep.mubr.bf16.mxu0 %v1078_v11 }
  0x71   :  { %802 = vmatprep.mubr.bf16.mxu1 %v1080_v15 }
  0x72   :  { %1210 = vmatpush3.bf16.msra.mxu0 %v1361_v46 }
  0x73   :  { %1232 = vmatpush3.bf16.msra.mxu1 %v1362_v47  ;;  %1211 = vmatprep.subr.bf16.mxu0 %v1363_v48 }
  0x74   :  { %1233 = vmatprep.subr.bf16.mxu1 %v1364_v49 }
  0x76   :  { %1212 = vmatpush3.bf16.msra.mxu0 %v1365_v50 }
  0x77   :  { %1234 = vmatpush3.bf16.msra.mxu1 %v1366_v51  ;;  %1213 = vmatprep.subr.bf16.mxu0 %v1367_v52 }
  0x78   :  { %1235 = vmatprep.subr.bf16.mxu1 %v1368_v53 }
  0x7a   :  { %1214 = vmatpush3.bf16.msra.mxu0 %v1369_v54 }
  0x7b   :  { %1236 = vmatpush3.bf16.msra.mxu1 %v1370_v55  ;;  %1215 = vmatprep.subr.bf16.mxu0 %v1371_v56 }
  0x7c   :  { %1237 = vmatprep.subr.bf16.mxu1 %v1372_v57 }
  0x7e   :  { %1216 = vmatpush3.bf16.msra.mxu0 %v1373_v58 }
  0x7f   :  { %1238 = vmatpush3.bf16.msra.mxu1 %v1374_v59  ;;  %1217 = vmatprep.subr.bf16.mxu0 %v1375_v60 }
  0x80   :  { %1239 = vmatprep.subr.bf16.mxu1 %v1376_v61 }
  0x82   :  { %1218 = vmatpush3.bf16.msra.mxu0 %v1377_v62 }
  0x83   :  { %1240 = vmatpush3.bf16.msra.mxu1 %v1378_v63  ;;  %1219 = vmatprep.subr.bf16.mxu0 %v1379_v0 }
  0x84   :  { %1241 = vmatprep.subr.bf16.mxu1 %v1380_v1  ;;  %v1401_v1 = vld [vmem:[#allocation8 + $0x30] sm:$0xff]  }
  0x86   :  { %1220 = vmatpush3.bf16.msra.mxu0 %v1381_v2  ;;  %v1402_v2 = vld [vmem:[#allocation8 + $0x38] sm:$0xff]  }
  0x87   :  { %1242 = vmatpush3.bf16.msra.mxu1 %v1382_v3  ;;  %1221 = vmatprep.subr.bf16.mxu0 %v1383_v4  ;;  %v1145_v3 = vld [vmem:[%s1719_s4 + $0x1] ss:$0 sm:$0xff] }
  0x88   :  { %1243 = vmatprep.subr.bf16.mxu1 %v1384_v5 }
  0x8a   :  { %1222 = vmatpush3.bf16.msra.mxu0 %v1385_v6 }
  0x8b   :  { %1244 = vmatpush3.bf16.msra.mxu1 %v1386_v7  ;;  %1269 = vmatprep.subr.bf16.mxu0 %v1553_v17 }
  0x8c   :  { %1289 = vmatprep.subr.bf16.mxu1 %v1553_v17 }
  0x8d   :  { %762 = vmatmul.mubr.bf16.vlgmr.msra.gmra.mrb[4].mxu0 %v1077_v10 }
  0x8e   :  { %803 = vmatmul.mubr.bf16.vlgmr.msra.gmra.mrb[4].mxu1 %v1079_v14  ;;  %1270 = vmatpush3.bf16.msra.mxu0 %v1387_v16 }
  0x8f   :  { %1271 = vmatprep.subr.bf16.mxu0 %v1553_v17  ;;  %1285 = vmatprep.mubr.msk.bf16.mxu0 %vm1554_vm0, %v1553_v17 }
  0x90   :  { %1305 = vmatprep.mubr.msk.bf16.mxu1 %vm1554_vm0, %v1553_v17  ;;  %1290 = vmatpush3.bf16.msra.mxu1 %v1395_v25 }
  0x91   :  { %1291 = vmatprep.subr.bf16.mxu1 %v1553_v17 }
  0x92   :  { %1272 = vmatpush3.bf16.msra.mxu0 %v1388_v18 }
  0x93   :  { %1273 = vmatprep.subr.bf16.mxu0 %v1553_v17 }
  0x94   :  { %1292 = vmatpush3.bf16.msra.mxu1 %v1396_v26 }
  0x95   :  { %1293 = vmatprep.subr.bf16.mxu1 %v1553_v17 }
  0x96   :  { %1274 = vmatpush3.bf16.msra.mxu0 %v1389_v19 }
  0x97   :  { %1275 = vmatprep.subr.bf16.mxu0 %v1553_v17 }
  0x98   :  { %1294 = vmatpush3.bf16.msra.mxu1 %v1397_v27 }
  0x99   :  { %1295 = vmatprep.subr.bf16.mxu1 %v1553_v17 }
  0x9a   :  { %1276 = vmatpush3.bf16.msra.mxu0 %v1390_v20 }
  0x9b   :  { %1277 = vmatprep.subr.bf16.mxu0 %v1553_v17 }
  0x9c   :  { %1296 = vmatpush3.bf16.msra.mxu1 %v1398_v28 }
  0x9d   :  { %1297 = vmatprep.subr.bf16.mxu1 %v1553_v17 }
  0x9e   :  { %1278 = vmatpush3.bf16.msra.mxu0 %v1391_v21 }
  0x9f   :  { %1279 = vmatprep.subr.bf16.mxu0 %v1553_v17 }
  0xa0   :  { %1298 = vmatpush3.bf16.msra.mxu1 %v1399_v29 }
  0xa1   :  { %1299 = vmatprep.subr.bf16.mxu1 %v1553_v17 }
  0xa2   :  { %1280 = vmatpush3.bf16.msra.mxu0 %v1392_v22 }
  0xa3   :  { %1281 = vmatprep.subr.bf16.mxu0 %v1553_v17 }
  0xa4   :  { %1300 = vmatpush3.bf16.msra.mxu1 %v1400_v30 }
  0xa5   :  { %1301 = vmatprep.subr.bf16.mxu1 %v1553_v17 }
  0xa6   :  { %1282 = vmatpush3.bf16.msra.mxu0 %v1393_v23 }
  0xa7   :  { %1283 = vmatprep.subr.bf16.mxu0 %v1553_v17 }
  0xa8   :  { %1302 = vmatpush3.bf16.msra.mxu1 %v1401_v1 }
  0xa9   :  { %1303 = vmatprep.subr.bf16.mxu1 %v1553_v17 }
  0xaa   :  { %1284 = vmatpush3.bf16.msra.mxu0 %v1394_v24 }
  0xac   :  { %1304 = vmatpush3.bf16.msra.mxu1 %v1402_v2 }
 0x140   :  { %v1179_v31 = vpop.f32.mrb[0].mxu0 }
 0x141   :  { %v1201_v32 = vpop.f32.mrb[0].mxu1  ;;  %v1180_v34 = vpop.f32.mrb[1].mxu0 }
 0x142   :  { %v1181_v35 = vadd.f32 %v1180_v34, %v1179_v31  ;;  %v1202_v36 = vpop.f32.mrb[1].mxu1  ;;  %v1182_v37 = vpop.f32.mrb[2].mxu0 }
 0x143   :  { %v1203_v38 = vadd.f32 %v1202_v36, %v1201_v32  ;;  %v1204_v39 = vpop.f32.mrb[2].mxu1  ;;  %v1183_v40 = vpop.f32.mrb[3].mxu0 }
 0x144   :  { %v682_v41 = vadd.f32 %v1181_v35, %v1072_v33  ;;  %v1184_v42 = vadd.f32 %v1183_v40, %v1182_v37  ;;  %v1205_v43 = vpop.f32.mrb[3].mxu1 }
 0x145   :  { %v1206_v44 = vadd.f32 %v1205_v43, %v1204_v39 }
 0x146   :  { %v723_v45 = vadd.f32 %v1203_v38, %v682_v41  ;;  %v685_v46 = vadd.f32 %v1184_v42, %v1072_v33 }
 0x148   :  { %v726_v47 = vadd.f32 %v1206_v44, %v685_v46 }
 0x160   :  { %v1223_v48 = vpop.f32.mrb[4].mxu0 }
 0x161   :  { %v1245_v49 = vpop.f32.mrb[4].mxu1  ;;  %v1224_v50 = vpop.f32.mrb[5].mxu0 }
 0x162   :  { %v1225_v51 = vadd.f32 %v1224_v50, %v1223_v48  ;;  %v1246_v52 = vpop.f32.mrb[5].mxu1  ;;  %v1226_v53 = vpop.f32.mrb[6].mxu0 }
 0x163   :  { %v1247_v54 = vadd.f32 %v1246_v52, %v1245_v49  ;;  %v1248_v55 = vpop.f32.mrb[6].mxu1  ;;  %v1227_v56 = vpop.f32.mrb[7].mxu0 }
 0x164   :  { %v764_v57 = vadd.f32 %v1225_v51, %v723_v45  ;;  %v1228_v58 = vadd.f32 %v1227_v56, %v1226_v53  ;;  %v1249_v59 = vpop.f32.mrb[7].mxu1 }
 0x165   :  { %v1250_v60 = vadd.f32 %v1249_v59, %v1248_v55 }
 0x166   :  { %v805_v61 = vadd.f32 %v1247_v54, %v764_v57  ;;  %v767_v62 = vadd.f32 %v1228_v58, %v726_v47 }
 0x168   :  { %811 = vst [vmem:[#allocation10] sm:$0xff] %v805_v61  ;;  %v808_v63 = vadd.f32 %v1250_v60, %v767_v62 }
 0x16a   :  { %812 = vst [vmem:[#allocation10 + $0x8] sm:$0xff] %v808_v63  ;;  %v813_v0 = vpack.c.bf16 %v808_v63, %v805_v61 }
 0x16c   :  { %1286 = vmatmul.mubr.bf16.vlgmr.msra.gmra.mrb[8].mxu0 %v813_v0 }
 0x23f   :  { %v916_v4 = vpop.f32.mrb[8].mxu0 }
 0x240   :  { %v917_v5 = vadd.f32 %v1145_v3, %v916_v4  ;;  %v1287_v6 = vpop.f32.mrb[9].mxu0 }
 0x241   :  { %v919_v7 = vpop.f32.mrb[10].mxu0 }
 0x242   :  { %v920_v8 = vadd.f32 %v1145_v3, %v919_v7  ;;  %v1288_v9 = vpop.f32.mrb[11].mxu0  ;;  %v923_v10 = vmax.f32 %v917_v5, 0.0 }
 0x244   :  { %v924_v11 = vmax.f32 %v920_v8, 0.0 }
 0x246   :  { %v925_v12 = vpack.c.bf16 %v924_v11, %v923_v10 }
 0x248   :  { %1306 = vmatmul.mubr.bf16.vlgmr.msra.gmra.mrb[8].mxu1 %v925_v12 }
 0x249   :  { %1502 = shalt.err (!%p1499_p8)
}
 0x24a   :  { %s1503_s29 = scalar_lea.hbm %s1720_s5, 256 }
 0x24b   :  { %p1504_p9 = scmp.ne.s32.totalorder %s1720_s5, %s1503_s29  ;;  %p1507_p10 = scmp.lt.u32.totalorder %s1503_s29, %s1720_s5 }
 0x24d   :  { %p1509_p11 = pnand %p1507_p10, %p1504_p9 }
 0x24f   :  { %1512 = shalt.err (!%p1509_p11)
}
 0x250   :  { %s1556_s13 = smov 128   ;;  %s1557_s0 = smov 8   ;;  %v1154_v13 = vld [vmem:[%s1719_s4 + $0x2] ss:$0 sm:$0xff] }
 0x251   :  { %1048 = dma.vmem_to_hbm [thread:$0]  %s1043_s25, 256, %s1720_s5, [#allocation4], %s1556_s13, %s1556_s13, %s1557_s0  }
 0x252   :  { %s1558_s17 = smov [#allocation11]  }
 0x253   :  { %s1054_s18 = sshll.u32 %s1558_s17, 4  ;;  %s1055_s18 = int_to_ptr.vmem [resolvable:$true] %s1054_s18 }
 0x254   :  { %s1513_s19 = scalar_lea.vmem %s1055_s18, 256  ;;  %p1518_p13 = scmp.lt.s32.totalorder %s1055_s18, %s1055_s18 }
 0x255   :  { %p1514_p12 = scmp.ne.s32.totalorder %s1055_s18, %s1513_s19  ;;  %p1519_p0 = scmp.lt.s32.totalorder %s1513_s19, %s1513_s19 }
 0x257   :  { %p1520_p1 = por %p1519_p0, %p1518_p13 }
 0x259   :  { %p1521_p2 = pnand %p1520_p1, %p1514_p12 }
 0x31b   :  { %v1028_v14 = vpop.f32.mrb[8].mxu1 }
 0x31c   :  { %v1029_v15 = vadd.f32 %v1154_v13, %v1028_v14  ;;  %v1307_v16 = vpop.f32.mrb[9].mxu1 }
 0x31d   :  { %v1031_v17 = vpop.f32.mrb[10].mxu1 }
 0x31e   :  { %1035 = vst [vmem:[#allocation11] sm:$0xff] %v1029_v15  ;;  %v1032_v18 = vadd.f32 %v1154_v13, %v1031_v17  ;;  %v1308_v19 = vpop.f32.mrb[11].mxu1 }
 0x320   :  { %1036 = vst [vmem:[#allocation11 + $0x8] sm:$0xff] %v1032_v18 }
 0x321   :  { %1524 = shalt.err (!%p1521_p2)
}
 0x322   :  { %s1525_s20 = scalar_lea.hbm %s1721_s6, 256 }
 0x323   :  { %p1526_p3 = scmp.ne.s32.totalorder %s1721_s6, %s1525_s20  ;;  %p1529_p4 = scmp.lt.u32.totalorder %s1525_s20, %s1721_s6 }
 0x325   :  { %p1531_p5 = pnand %p1529_p4, %p1526_p3 }
 0x327   :  { %1534 = shalt.err (!%p1531_p5)
}
 0x328   :  { %1060 = dma.vmem_to_hbm [thread:$0]  %s1055_s18, 256, %s1721_s6, [#allocation12], %s1556_s13, %s1556_s13, %s1557_s0  }
 0x329   :  { %1541 = dma.done.wait [#allocation4], 256  }
 0x32a   :  { %1542 = vsyncadd [#allocation4], 4294967040 }
 0x32b   :  { %1543 = dma.done.wait [#allocation12], 256  }
 0x32c   :  { %1544 = vsyncadd [#allocation12], 4294967040 }
 0x32d   :  { %1067 = vsyncpa [#allocation3], 1 }
 0x32e   :  { %1068 = vsyncpa [#allocation6], 1 }
 0x32f   :  { %1069 = vsyncpa [#allocation9], 1 }
 0x330   :  { %1070 = vsyncpa [#allocation4], 1 }
 0x331   :  { %1071 = vsyncpa [#allocation12], 1 }

</bundles_post_ra>
